<compile_context>
chip_gen: v7x
topology: tpu7x:2x2x1
jax: 0.10.0
libtpu: 0.0.40
codegen_flags: <defaults>
</compile_context>

<pallas_src>
import functools

import jax
import jax.numpy as jnp
from jax.experimental import pallas as pl
from jax.experimental.pallas import tpu as pltpu


# ----------------------------------------------------------------------------
# Tile selection: biggest lane tile (multiple of 128, or full extent) that keeps
# double-buffered in+out blocks well inside scoped VMEM.  Budget is sized for
# v7x's smaller VMEM (64 MiB physical / 32 MiB scoped default); v5e/v6e have
# more headroom, so the same choice is safe everywhere.
# ----------------------------------------------------------------------------
def _pick_tile(hw, c, itemsize=4, vmem_budget=8 * 1024 * 1024, max_tile=2048):
    cap = hw if hw <= max_tile else max_tile          # full-extent last dim is always legal
    by_vmem = vmem_budget // (4 * max(c, 8) * itemsize)   # 2 bufs x (in + out) blocks
    tile = min(cap, max(128, by_vmem))
    if tile != hw:
        tile = max(128, (tile // 128) * 128)          # must be a multiple of 128 unless == hw
    return tile


# ----------------------------------------------------------------------------
# Init kernels: tiled two-pass reduction over the (N, H*W) grid into a resident
# (C, 1) accumulator output (output block index is constant across the grid).
# ----------------------------------------------------------------------------
def _sum_kernel(x_ref, sum_ref, *, hw, tile):
    @pl.when((pl.program_id(0) == 0) & (pl.program_id(1) == 0))
    def _init():
        sum_ref[...] = jnp.zeros_like(sum_ref)

    x = x_ref[...].astype(jnp.float32)                # (C, tile), f32 accumulation
    if hw % tile != 0:                                # mask the ragged last tile
        col = pl.program_id(1) * tile + jax.lax.broadcasted_iota(jnp.int32, x.shape, 1)
        x = jnp.where(col < hw, x, 0.0)
    sum_ref[...] += jnp.sum(x, axis=1, keepdims=True)


def _sqsum_kernel(x_ref, mean_ref, sq_ref, *, hw, tile):
    @pl.when((pl.program_id(0) == 0) & (pl.program_id(1) == 0))
    def _init():
        sq_ref[...] = jnp.zeros_like(sq_ref)

    d = x_ref[...].astype(jnp.float32) - mean_ref[...]    # two-pass: centered before squaring
    sq = d * d
    if hw % tile != 0:
        col = pl.program_id(1) * tile + jax.lax.broadcasted_iota(jnp.int32, sq.shape, 1)
        sq = jnp.where(col < hw, sq, 0.0)
    sq_ref[...] += jnp.sum(sq, axis=1, keepdims=True)


# ----------------------------------------------------------------------------
# Apply kernel: single fused multiply-add per element.  exp(+-log_std) and the
# bias fold are hoisted into the wrapper (tiny (C,1) XLA ops), so the kernel is
# purely DMA-bound.  Math kept in f32 (v5e has no bf16 VPU path).
# ----------------------------------------------------------------------------
def _scale_bias_kernel(x_ref, scale_ref, bias_ref, y_ref):
    x = x_ref[...].astype(jnp.float32)                # (C, tile)
    y_ref[...] = (x * scale_ref[...] + bias_ref[...]).astype(y_ref.dtype)


# ----------------------------------------------------------------------------
# Python wrappers (glue only)
# ----------------------------------------------------------------------------
def actnorm_init(x):
    """Data-dependent parameter initialization (first forward call in PyTorch)."""
    n, c, h, w = x.shape
    hw = h * w
    p = n * hw
    x3 = x.reshape(n, c, hw)                          # free view of NCHW, no transpose
    tile = _pick_tile(hw, c)
    grid = (n, pl.cdiv(hw, tile))

    x_spec = pl.BlockSpec((None, c, tile), lambda i, j: (i, 0, j))   # N dim squeezed
    acc_spec = pl.BlockSpec((c, 1), lambda i, j: (0, 0))             # resident accumulator
    reduce_params = pltpu.CompilerParams(
        dimension_semantics=("arbitrary", "arbitrary"))
    # TODO(synk): for v7x megacore a per-core partial-sum over a leading "parallel"
    # axis would use both TensorCores; init runs once so it is kept single-core.

    sums = pl.pallas_call(
        functools.partial(_sum_kernel, hw=hw, tile=tile),
        out_shape=jax.ShapeDtypeStruct((c, 1), jnp.float32),
        grid=grid,
        in_specs=[x_spec],
        out_specs=acc_spec,
        compiler_params=reduce_params,
    )(x3)
    mean = sums / p                                   # (C, 1)

    sqsum = pl.pallas_call(
        functools.partial(_sqsum_kernel, hw=hw, tile=tile),
        out_shape=jax.ShapeDtypeStruct((c, 1), jnp.float32),
        grid=grid,
        in_specs=[x_spec, pl.BlockSpec((c, 1), lambda i, j: (0, 0))],
        out_specs=acc_spec,
        compiler_params=reduce_params,
    )(x3, mean)

    denom = max(p - 1, 1)                             # guard N*H*W == 1 (torch std(ddof=1) -> NaN)
    std = jnp.maximum(jnp.sqrt(sqsum / denom), 1e-16) # clamp(min=1e-16)
    log_std = jnp.log(std)
    return mean, log_std                              # each (C, 1), float32


def actnorm_apply(x, mean, log_std, inverse=False):
    """ActNorm forward (or inverse) pass.  Returns (y, LDJ) like the PyTorch module."""
    n, c, h, w = x.shape
    hw = h * w
    x3 = x.reshape(n, c, hw)                          # free view, no transpose

    mean = mean.reshape(c, 1).astype(jnp.float32)
    log_std = log_std.reshape(c, 1).astype(jnp.float32)
    if inverse:                                       # x = y * exp(log_std) + mean
        scale = jnp.exp(log_std)
        bias = mean
    else:                                             # y = (x - mean) * exp(-log_std)
        scale = jnp.exp(-log_std)
        bias = -mean * scale

    tile = _pick_tile(hw, c)
    grid = (n, pl.cdiv(hw, tile))                     # ragged last tile handled by Pallas

    y3 = pl.pallas_call(
        _scale_bias_kernel,
        out_shape=jax.ShapeDtypeStruct((n, c, hw), x.dtype),
        grid=grid,
        in_specs=[pl.BlockSpec((None, c, tile), lambda i, j: (i, 0, j)),
                  pl.BlockSpec((c, 1), lambda i, j: (0, 0)),
                  pl.BlockSpec((c, 1), lambda i, j: (0, 0))],
        out_specs=pl.BlockSpec((None, c, tile), lambda i, j: (i, 0, j)),
        compiler_params=pltpu.CompilerParams(
            dimension_semantics=("parallel", "parallel")),   # both axes independent -> megacore
    )(x3, scale, bias)

    y = y3.reshape(n, c, h, w)                        # free view back to NCHW

    pixels = h * w
    sign = 1.0 if inverse else -1.0
    ldj = sign * jnp.sum(log_std) * pixels            # scalar
    LDJ = jnp.broadcast_to(ldj, (n,))                 # .repeat(batch_size)
    # TODO(synk): check_tensors() is an external debug/NaN-check helper with no
    # numerical effect; omitted.
    return y, LDJ


# ----------------------------------------------------------------------------
if __name__ == "__main__":
    key = jax.random.PRNGKey(0)
    k1, k2, k3 = jax.random.split(key, 3)

    N, C, H, W = 2, 4, 16, 16
    # non-trivial per-channel offsets/scales so the data-dependent init matters
    x = (jax.random.normal(k1, (N, C, H, W), jnp.float32)
         * (1.0 + jax.random.uniform(k2, (1, C, 1, 1)))
         + jax.random.normal(k3, (1, C, 1, 1)))

    # data-dependent init of the (C,1,1) parameters — like the first PyTorch forward
    mean, log_std = actnorm_init(x)

    # forward pass
    y, LDJ = actnorm_apply(x, mean, log_std, inverse=False)
    y = jax.block_until_ready(y)
    LDJ = jax.block_until_ready(LDJ)

    # pure-JAX reference (mirrors the PyTorch math exactly)
    xv = jnp.transpose(x, (1, 0, 2, 3)).reshape(C, -1)
    ref_mean = jnp.mean(xv, axis=-1).reshape(C, 1, 1)
    ref_std = jnp.std(xv, axis=-1, ddof=1).reshape(C, 1, 1)
    ref_logstd = jnp.log(jnp.maximum(ref_std, 1e-16))
    ref_y = (x - ref_mean[None]) * jnp.exp(-ref_logstd[None])
    ref_LDJ = jnp.broadcast_to(-jnp.sum(ref_logstd) * (H * W), (N,))

    assert jnp.allclose(mean.reshape(-1), ref_mean.reshape(-1), atol=1e-5, rtol=1e-5), "mean mismatch"
    assert jnp.allclose(log_std.reshape(-1), ref_logstd.reshape(-1), atol=1e-5, rtol=1e-5), "log_std mismatch"
    assert jnp.allclose(y, ref_y, atol=1e-5, rtol=1e-5), "y mismatch"
    assert jnp.allclose(LDJ, ref_LDJ, atol=1e-4, rtol=1e-5), "LDJ mismatch"

    # also exercise the inverse path (round trip)
    x_rec, LDJ_inv = actnorm_apply(y, mean, log_std, inverse=True)
    x_rec = jax.block_until_ready(x_rec)
    assert jnp.allclose(x_rec, x, atol=1e-4, rtol=1e-5), "inverse round-trip mismatch"
    assert jnp.allclose(LDJ_inv, -ref_LDJ, atol=1e-4, rtol=1e-5), "inverse LDJ mismatch"

    print("KERNEL_OK")
</pallas_src>

<mosaic_0001>
module attributes {stable_mosaic.version = 11 : i64} {
  func.func @_sum_kernel(%arg0: i32, %arg1: i32, %arg2: memref<1x4x256xf32, #tpu.memory_space<vmem>>, %arg3: memref<4x1xf32, #tpu.memory_space<vmem>>) attributes {dimension_semantics = [#tpu.dimension_semantics<arbitrary>, #tpu.dimension_semantics<arbitrary>], iteration_bounds = array<i64: 2, 1>, scalar_prefetch = 0 : i64, scratch_operands = 0 : i64, tpu.core_type = #tpu.core_type<tc>, window_params = [{transform_indices = @transform_0, window_bounds = array<i64: 1, 4, 256>}, {pipeline_mode = #tpu.pipeline_mode<synchronous>, transform_indices = @transform_1, window_bounds = array<i64: 4, 1>}]} {
    %c0_i32 = arith.constant 0 : i32
    %0 = arith.cmpi eq, %arg0, %c0_i32 : i32
    %c0_i32_0 = arith.constant 0 : i32
    %1 = arith.cmpi eq, %arg1, %c0_i32_0 : i32
    %2 = arith.andi %0, %1 : i1
    %3 = arith.extui %2 : i1 to i32
    %c0_i32_1 = arith.constant 0 : i32
    %4 = arith.cmpi ne, %3, %c0_i32_1 : i32
    scf.if %4 {
      %cst_8 = arith.constant 0.000000e+00 : f32
      %12 = vector.broadcast %cst_8 : f32 to vector<4x1xf32>
      %c0_9 = arith.constant 0 : index
      %c0_10 = arith.constant 0 : index
      %13 = vector.load %arg3[%c0_9, %c0_10] : memref<4x1xf32, #tpu.memory_space<vmem>>, vector<4x1xf32>
      tpu.vector_store %arg3[%c0_9, %c0_10], %12 {strides = array<i32>} : memref<4x1xf32, #tpu.memory_space<vmem>>, vector<4x1xf32>,
    } else {
    }
    %c0 = arith.constant 0 : index
    %c0_2 = arith.constant 0 : index
    %c0_3 = arith.constant 0 : index
    %5 = vector.load %arg2[%c0, %c0_2, %c0_3] : memref<1x4x256xf32, #tpu.memory_space<vmem>>, vector<1x4x256xf32>
    %6 = vector.shape_cast %5 : vector<1x4x256xf32> to vector<4x256xf32>
    %c0_4 = arith.constant 0 : index
    %c0_5 = arith.constant 0 : index
    %7 = vector.load %arg3[%c0_4, %c0_5] : memref<4x1xf32, #tpu.memory_space<vmem>>, vector<4x1xf32>
    %cst = arith.constant dense<0.000000e+00> : vector<4xf32>
    %8 = vector.multi_reduction <add>, %6, %cst [1] : vector<4x256xf32> to vector<4xf32>
    %9 = vector.shape_cast %8 : vector<4xf32> to vector<4x1xf32>
    %10 = arith.addf %7, %9 : vector<4x1xf32>
    %c0_6 = arith.constant 0 : index
    %c0_7 = arith.constant 0 : index
    %11 = vector.load %arg3[%c0_6, %c0_7] : memref<4x1xf32, #tpu.memory_space<vmem>>, vector<4x1xf32>
    tpu.vector_store %arg3[%c0_6, %c0_7], %10 {strides = array<i32>} : memref<4x1xf32, #tpu.memory_space<vmem>>, vector<4x1xf32>,
    return
  }
  func.func @transform_0(%arg0: i32, %arg1: i32) -> (i32, i32, i32) {
    %c0_i32 = arith.constant 0 : i32
    %c0_i32_0 = arith.constant 0 : i32
    return %arg0, %c0_i32, %arg1 : i32, i32, i32
  }
  func.func @transform_1(%arg0: i32, %arg1: i32) -> (i32, i32) {
    %c0_i32 = arith.constant 0 : i32
    %c0_i32_0 = arith.constant 0 : i32
    %c0_i32_1 = arith.constant 0 : i32
    return %c0_i32, %c0_i32_0 : i32, i32
  }
}

</mosaic_0001>

<bundles_post_ra>
// kernel: tpu_custom_call.1
= control target key start
LH: loop header
LB: loop body
LE: loop exit
PB: predicated region body
PF: predicated region fallthrough
CT: control target
= control target key end

     0   :  { %6 = vsyncpa [#allocation3], 0  ;;  %s504_s0 = inlined_call_operand.hbm [shape: f32[2,4,256], index: 0, kind: input, shape index: {}]   ;;  %s505_s1 = inlined_call_operand.vmem [shape: f32[4,1], index: 1, kind: output, shape index: {}]  }
   0x1   :  { %8 = vsyncpa [#allocation3 + $0x1], 0  ;;  %s374_s6 = smov 0   ;;  %s376_s7 = smov 0  }
   0x2   :  { %s378_s8 = smov 0   ;;  %s380_s9 = smov 0  }
   0x3   :  { %s382_s10 = smov 0   ;;  %s384_s11 = smov 0  }
   0x4 LB: > { %s210_s12 = sadd.s32 4294967295, %s360_s11   ;;  %s26_s13 = sadd.s32 1, %s356_s10  ;;  %s360_s11 = sphi %s384_s11, %s14_s11   ;;  %s356_s10 = sphi %s382_s10, %s515_s10   ;;  %s352_s9 = sphi %s380_s9, %s514_s9   ;;  %s348_s8 = sphi %s378_s8, %s513_s8   ;;  %s344_s7 = sphi %s376_s7, %s512_s7   ;;  %s340_s6 = sphi %s374_s6, %s511_s6  }
   0x5   : > { %p28_p0 = scmp.ge.s32.totalorder %s26_s13, 2  ;;  %s35_s14 = sadd.s32 1, %s348_s8 }
   0x6   : > { %p42_p1 = scmp.ne.s32.totalorder %s348_s8, %s344_s7  ;;  %p43_p2 = scmp.eq.s32.totalorder %s360_s11, 0 }
   0x7   : > { %s517_s13 = smov (%p28_p0, %s26_s13), 0  ;;  %p48_p4 = scmp.ne.s32.totalorder %s344_s7, %s340_s6 }
   0x8   : > { %p410_p3 = por %p43_p2, %p42_p1  ;;  %s30_s16 = ssub.s32 %s356_s10, %s517_s13 }
   0x9   : > { %p49_p5 = scmp.eq.s32.totalorder %s210_s12, 0  ;;  %p33_p6 = scmp.eq.s32.totalorder %s30_s16, 0 }
   0xa   : > { %p229_p8 = scmp.lt.s32.totalorder %s360_s11, 2  ;;  %s93_s19 = sand.u32 1, %s348_s8  }
   0xb   : > { %p417_p7 = por %p49_p5, %p48_p4  ;;  %s221_s20 = sshll.u32 %s356_s10, 7 }
   0xc   : > { %s423_s18 = scalar_select %p33_p6, %s348_s8, %s35_s14  }
   0xd   : > { %s213_s21 = sshll.u32 %s93_s19, 3  ;;  %s430_s24 = scalar_lea.hbm %s504_s0, %s221_s20 }
   0xe   : > { %s97_s25 = scalar_lea.vmem [#allocation2], %s213_s21  ;;  %p434_p9 = pnand %p229_p8, %p410_p3 }
   0xf   : > { %s107_s26 = sshll.u32 %s97_s25, 4  ;;  %s94_s28 = scalar_lea.sflag [#allocation3], %s93_s19  ;;  %s438_s26 = int_to_ptr.vmem [resolvable:$true] %s107_s26 }
  0x10   : > { %s280_s29 = scalar_lea.hbm %s430_s24, 128  ;;  %p282_p13 = pneg %p434_p9 }
  0x11   : > { %p281_p12 = scmp.ne.s32.totalorder %s430_s24, %s280_s29  ;;  %s285_s3 = scalar_lea.hbm %s504_s0, 256 }
  0x12   : > { %p286_p2 = scmp.lt.u32.totalorder %s430_s24, %s504_s0  ;;  %p287_p3 = scmp.lt.u32.totalorder %s285_s3, %s280_s29 }
  0x13   : > { %p283_p0 = pnand %p282_p13, %p281_p12  ;;  %p289_p5 = scmp.lt.u32.totalorder %s280_s29, %s430_s24 }
  0x14   : > { %p288_p4 = por %p287_p3, %p286_p2 }
  0x15   : > { %p284_p1 = pneg %p283_p0 }
  0x16   : > { %p290_p6 = por %p289_p5, %p288_p4 }
  0x18   : > { %p291_p8 = pnand %p290_p6, %p284_p1 }
  0x1a   : > { %294 = shalt.err (!%p291_p8)
}
  0x1b   : > { %s295_s6 = scalar_lea.vmem %s438_s26, 128  ;;  %s362_s12 = smov [#allocation2]  }
  0x1c   : > { %p296_p12 = scmp.ne.s32.totalorder %s438_s26, %s295_s6  ;;  %s300_s14 = sshll.u32 %s362_s12, 4  ;;  %s301_s14 = int_to_ptr.vmem [resolvable:$false] %s300_s14 }
  0x1d   : > { %s302_s15 = scalar_lea.vmem %s301_s14, 256  ;;  %p303_p11 = scmp.lt.s32.totalorder %s438_s26, %s301_s14 }
  0x1e   : > { %p298_p0 = pnand %p296_p12, %p282_p13  ;;  %p304_p2 = scmp.lt.s32.totalorder %s302_s15, %s295_s6 }
  0x20   : > { %p299_p10 = pneg %p298_p0  ;;  %p305_p3 = por %p304_p2, %p303_p11 }
  0x22   : > { %p306_p4 = pnand %p305_p3, %p299_p10 }
  0x24   : > { %309 = shalt.err (!%p306_p4)
}
  0x25   : > { %228 = dma.hbm_to_vmem [thread:$0]  (!%p434_p9), %s430_s24, 128, %s438_s26, %s94_s28  }
  0x26   : > { %p509_p1 = scmp.lt.s32.totalorder %s360_s11, 3  ;;  %p510_p5 = scmp.ge.s32.totalorder %s360_s11, 1 }
  0x28   : > { %p113_p13 = pnand %p510_p5, %p509_p1 }
  0x29   : > { %s118_s16 = sand.u32 (!%p113_p13), 1, %s344_s7  }
  0x2a   : > { %116 = sbr.rel (%p113_p13) target bundleno = 210 (0xd2), region = 24  ;;  %s217_s19 = sshll.u32 (!%p113_p13), %s118_s16, 3 }
  0x2b   : > { %s119_s20 = scalar_lea.sflag (!%p113_p13), [#allocation3], %s118_s16  ;;  %s122_s21 = scalar_lea.vmem (!%p113_p13), [#allocation2], %s217_s19 }
  0x31   : > { %335 = dma.done.wait (%p417_p7), %s119_s20, 128  }
  0x32   : > { %337 = vsyncadd (%p417_p7), %s119_s20, 4294967168  ;;  %p137_p10 = scmp.eq.s32.totalorder %s352_s9, 0 }
  0x33   : > { %vm143_vm0 = vcmask (%p137_p10), 3072   ;;  %v363_v0 = vmov (%p137_p10), 0.0  }
  0x34   : > { %142 = sbr.rel (!%p137_p10) target bundleno = 59 (0x3b), region = 32  ;;  %144 = vst.msk [vmem:[%s505_s1] sm:$0xf] (%p137_p10), %vm143_vm0, %v363_v0 }
  0x3b PF: > { %v145_v1 = vld [vmem:[%s122_s21] sm:$0xff]  ;;  %vm150_vm1 = vcmask 1043456   ;;  %vm157_vm2 = vcmask 3072  }
  0x3c   : > { %v148_v2 = vcombine.high %v145_v1, %v145_v1  ;;  %v151_v3 = vsel %vm150_vm1, %v145_v1, 0.0  ;;  %v146_v6 = vld [vmem:[%s505_s1] sm:$0xf] }
  0x3e   : > { %v152_v4 = vsel %vm150_vm1, %v148_v2, 0.0 }
  0x3f   : > { %v153_v5 = vadd.f32 %v152_v4, %v151_v3 }
  0x41   : > { %154 = vadd.xlane.f32.xlu0 %v153_v5 }
  0xce   : > { %v155_v7 = vpop.xlane.xlu0 %154 }
  0xcf   : > { %v156_v8 = vadd.f32 %v155_v7, %v146_v6 }
  0xd1   : > { %158 = vst.msk [vmem:[%s505_s1] sm:$0xf] %vm157_vm2, %v156_v8 }
  0xd2 PF: > { %s14_s11 = sadd.s32 1, %s360_s11   ;;  %s511_s6 = smov %s344_s7 }
  0xd3   : > { %p11_p7 = scmp.ge.s32.totalorder %s14_s11, 4   ;;  %s512_s7 = smov %s348_s8 }
  0xd4   : > { %s513_s8 = smov %s423_s18  ;;  %s514_s9 = smov %s356_s10 }
  0xd5   : > { %s515_s10 = smov %s517_s13  ;;  %13 = sbr.rel (!%p11_p7) target bundleno = 4 (0x4), region = 64 }
  0xdc   :  { %170 = vsyncpa [#allocation3], 1 }
  0xdd   :  { %172 = vsyncpa [#allocation3 + $0x1], 1 }

</bundles_post_ra>
